<compile_context>
chip_gen: v5e
topology: v5e:2x2
jax: 0.10.0
libtpu: 0.0.40
codegen_flags: <defaults>
</compile_context>

<pallas_src>
import numpy as np
import jax
import jax.numpy as jnp
from jax.experimental import pallas as pl
from jax.experimental.pallas import tpu as pltpu


def _col_matrix(w: int) -> np.ndarray:
    """(W, W) constant: fused two-level column Haar + stride-4 compaction, scaled 1/16.

    Output column q*W4 + j = sum_i csign[q][i] * (input column 4*j + i) / 16, where
    q = 2*fc2 + fc1 indexes (level-2 op, level-1 op) along W (0 = sum, 1 = diff).
    Entries are +/-2^-4 (exact in bf16), so the MXU stage is exact for bf16-exact data
    regardless of how the backend emulates the f32 matmul.
    """
    w4 = w // 4
    csign = np.array(
        [[1, 1, 1, 1],     # q=0: (sum,  sum )
         [1, -1, 1, -1],   # q=1: (sum,  diff)
         [1, 1, -1, -1],   # q=2: (diff, sum )
         [1, -1, -1, 1]],  # q=3: (diff, diff)
        dtype=np.float32)
    m = np.zeros((w, w), dtype=np.float32)
    for q in range(4):
        for j in range(w4):
            for i in range(4):
                m[4 * j + i, q * w4 + j] = csign[q, i] * (1.0 / 16.0)
    return m


def _haar2_kernel(x_ref, m_ref, o_ref):
    """x_ref: (4*TR, W) input rows; m_ref: (W, W); o_ref: (16, TR, W/4).

    o_ref[s] with s = f2*4 + f1 is the (level-2 band f2, level-1 band f1) output tile,
    already matching F.conv2d(haar, stride=2, groups)/4 applied twice.
    """
    tr = o_ref.shape[1]
    w4 = o_ref.shape[2]
    m = m_ref[...]

    # Row phases i = 0..3 of every 4-row group (sublane-strided loads), then the full
    # column-direction transform + compaction on the MXU (free: kernel is HBM-bound).
    y = []
    for i in range(4):
        r_i = x_ref[pl.ds(i, tr, stride=4), :].astype(jnp.float32)
        y.append(jnp.dot(r_i, m, preferred_element_type=jnp.float32))

    # Row-direction two-level Haar: 8 VPU butterflies.
    s01, d01 = y[0] + y[1], y[0] - y[1]
    s23, d23 = y[2] + y[3], y[2] - y[3]
    row_t = ((s01 + s23, d01 + d23),   # fr2 = 0: (fr1 = 0, fr1 = 1)
             (s01 - s23, d01 - d23))   # fr2 = 1

    for fr2 in range(2):
        for fr1 in range(2):
            rt = row_t[fr2][fr1]
            for fc2 in range(2):
                for fc1 in range(2):
                    q = 2 * fc2 + fc1                       # column sub-band block in rt
                    s = 4 * (2 * fr2 + fc2) + (2 * fr1 + fc1)  # = f2*4 + f1
                    o_ref[s, :, :] = rt[:, q * w4:(q + 1) * w4].astype(o_ref.dtype)


def _choose_out_row_tile(h4: int, w: int) -> int:
    """Output-row tile TR: full H/4, or a multiple of 8 dividing H/4 giving ~2 MiB
    input blocks (amortizes per-step overhead while staying VMEM-safe on v7x)."""
    target = max(8, (2 * 1024 * 1024) // (4 * 4 * max(w, 1)))  # 4 in-rows * 4 B per out-row
    if h4 <= target:
        return h4
    tr = min(target, h4)
    tr -= tr % 8
    while tr >= 8:
        if h4 % tr == 0:
            return tr
        tr -= 8
    return h4


def haar_downsampling_x2(x):
    """Two cascaded HaarDownsampling.forward(rev=False) steps fused into one pass.

    x: (B, C, H, W), H % 4 == 0, W % 4 == 0.
    Returns (B, 16*C, H//4, W//4) with torch's channel order f2*4*C + f1*C + c.
    """
    b, c, h, w = x.shape
    if h % 4 or w % 4:
        raise ValueError("haar_downsampling_x2 requires H and W divisible by 4")
    h4, w4 = h // 4, w // 4
    tr = _choose_out_row_tile(h4, w)
    nh = h4 // tr
    m = jnp.asarray(_col_matrix(w))

    out5 = pl.pallas_call(
        _haar2_kernel,
        out_shape=jax.ShapeDtypeStruct((b, 16, c, h4, w4), x.dtype),
        grid=(b, c, nh),
        in_specs=[
            # NCHW input read directly: 4*TR consecutive rows, full width.
            pl.BlockSpec((None, None, 4 * tr, w), lambda bi, ci, hi: (bi, ci, hi, 0)),
            # Constant column-transform matrix: same block every step -> stays resident.
            pl.BlockSpec((w, w), lambda bi, ci, hi: (0, 0)),
        ],
        # Sub-band index gets its own (full) dim so the final reshape below is free.
        out_specs=pl.BlockSpec((None, 16, None, tr, w4),
                               lambda bi, ci, hi: (bi, 0, ci, hi, 0)),
        compiler_params=pltpu.CompilerParams(
            dimension_semantics=("parallel", "parallel", "parallel"),
            vmem_limit_bytes=48 * 1024 * 1024,  # headroom, still < v7x physical VMEM
        ),
    )(x, m)

    # (B, 16, C, H4, W4) -> (B, 16C, H4, W4): channel = (f2*4+f1)*C + c = f2*4C + f1*C + c.
    # Pure layout-preserving reshape: no transpose, no extra HBM traffic.
    return out5.reshape(b, 16 * c, h4, w4)


def harrnet_forward(x, down_num=2):
    """HarrNet.forward(x, rev=False, cal_jacobian=False)."""
    if down_num % 2:
        # TODO(synk): odd down_num would need one extra single-level pass.
        raise NotImplementedError("harrnet_forward: only even down_num is implemented")
    out = x
    for _ in range(down_num // 2):
        out = haar_downsampling_x2(out)
    return out


# ---------------- pure-JAX reference (for correctness check only) -----------
def _haar_ref(x):
    a = x[:, :, 0::2, 0::2]
    b = x[:, :, 0::2, 1::2]
    c = x[:, :, 1::2, 0::2]
    d = x[:, :, 1::2, 1::2]
    return jnp.concatenate(
        [(a + b + c + d), (a - b + c - d), (a + b - c - d), (a - b - c + d)],
        axis=1) * 0.25


def _ref_forward(x, down_num=2):
    out = x
    for _ in range(down_num):
        out = _haar_ref(out)
    return out


if __name__ == "__main__":
    key = jax.random.PRNGKey(0)
    # HarrNet docstring: input (b, 3, h, w) -> output (b, 3*4**down_num, h//4, w//4).
    x = jax.random.normal(key, (2, 3, 16, 16), dtype=jnp.float32)
    # Snap inputs to bf16-representable f32 values so the check is exact no matter how
    # the backend emulates the f32 MXU matmul used for the column stage (+/-2^-4 weights).
    x = x.astype(jnp.bfloat16).astype(jnp.float32)

    out = jax.jit(harrnet_forward)(x)
    out = jax.block_until_ready(out)

    assert out.shape == (2, 48, 4, 4), out.shape
    ref = _ref_forward(x)
    max_err = float(jnp.max(jnp.abs(out - ref)))
    assert jnp.allclose(out, ref, atol=1e-5, rtol=1e-5), f"mismatch vs reference: {max_err}"

    print("KERNEL_OK")
</pallas_src>

<mosaic_0001>
module attributes {stable_mosaic.version = 11 : i64} {
  func.func @_haar2_kernel(%arg0: i32, %arg1: i32, %arg2: i32, %arg3: memref<1x1x16x16xf32, #tpu.memory_space<vmem>>, %arg4: memref<16x16xf32, #tpu.memory_space<vmem>>, %arg5: memref<1x16x1x4x4xf32, #tpu.memory_space<vmem>>) attributes {dimension_semantics = [#tpu.dimension_semantics<parallel>, #tpu.dimension_semantics<parallel>, #tpu.dimension_semantics<parallel>], iteration_bounds = array<i64: 2, 3, 1>, scalar_prefetch = 0 : i64, scratch_operands = 0 : i64, tpu.core_type = #tpu.core_type<tc>, window_params = [{transform_indices = @transform_0, window_bounds = array<i64: 1, 1, 16, 16>}, {pipeline_mode = #tpu.pipeline_mode<synchronous>, transform_indices = @transform_1, window_bounds = array<i64: 16, 16>}, {transform_indices = @transform_2, window_bounds = array<i64: 1, 16, 1, 4, 4>}]} {
    %c0 = arith.constant 0 : index
    %c0_0 = arith.constant 0 : index
    %0 = vector.load %arg4[%c0, %c0_0] : memref<16x16xf32, #tpu.memory_space<vmem>>, vector<16x16xf32>
    %c0_1 = arith.constant 0 : index
    %c0_2 = arith.constant 0 : index
    %c0_3 = arith.constant 0 : index
    %c0_4 = arith.constant 0 : index
    %1 = tpu.strided_load %arg3[%c0_1, %c0_2, %c0_3, %c0_4] {strides = array<i32: 1, 1, 4, 1>} : memref<1x1x16x16xf32, #tpu.memory_space<vmem>>, vector<1x1x4x16xf32>
    %2 = vector.shape_cast %1 : vector<1x1x4x16xf32> to vector<4x16xf32>
    %cst = arith.constant dense<0.000000e+00> : vector<4x16xf32>
    %3 = tpu.matmul %2, %0, %cst {dimension_numbers = #tpu.dot_dimension_numbers<[1], [0], [0], [1], [0, 0, 1, 1], [], []>} : vector<4x16xf32>, vector<16x16xf32>, vector<4x16xf32> -> vector<4x16xf32>
    %c0_5 = arith.constant 0 : index
    %c0_6 = arith.constant 0 : index
    %c1 = arith.constant 1 : index
    %c0_7 = arith.constant 0 : index
    %4 = tpu.strided_load %arg3[%c0_5, %c0_6, %c1, %c0_7] {strides = array<i32: 1, 1, 4, 1>} : memref<1x1x16x16xf32, #tpu.memory_space<vmem>>, vector<1x1x4x16xf32>
    %5 = vector.shape_cast %4 : vector<1x1x4x16xf32> to vector<4x16xf32>
    %cst_8 = arith.constant dense<0.000000e+00> : vector<4x16xf32>
    %6 = tpu.matmul %5, %0, %cst_8 {dimension_numbers = #tpu.dot_dimension_numbers<[1], [0], [0], [1], [0, 0, 1, 1], [], []>} : vector<4x16xf32>, vector<16x16xf32>, vector<4x16xf32> -> vector<4x16xf32>
    %c0_9 = arith.constant 0 : index
    %c0_10 = arith.constant 0 : index
    %c2 = arith.constant 2 : index
    %c0_11 = arith.constant 0 : index
    %7 = tpu.strided_load %arg3[%c0_9, %c0_10, %c2, %c0_11] {strides = array<i32: 1, 1, 4, 1>} : memref<1x1x16x16xf32, #tpu.memory_space<vmem>>, vector<1x1x4x16xf32>
    %8 = vector.shape_cast %7 : vector<1x1x4x16xf32> to vector<4x16xf32>
    %cst_12 = arith.constant dense<0.000000e+00> : vector<4x16xf32>
    %9 = tpu.matmul %8, %0, %cst_12 {dimension_numbers = #tpu.dot_dimension_numbers<[1], [0], [0], [1], [0, 0, 1, 1], [], []>} : vector<4x16xf32>, vector<16x16xf32>, vector<4x16xf32> -> vector<4x16xf32>
    %c0_13 = arith.constant 0 : index
    %c0_14 = arith.constant 0 : index
    %c3 = arith.constant 3 : index
    %c0_15 = arith.constant 0 : index
    %10 = tpu.strided_load %arg3[%c0_13, %c0_14, %c3, %c0_15] {strides = array<i32: 1, 1, 4, 1>} : memref<1x1x16x16xf32, #tpu.memory_space<vmem>>, vector<1x1x4x16xf32>
    %11 = vector.shape_cast %10 : vector<1x1x4x16xf32> to vector<4x16xf32>
    %cst_16 = arith.constant dense<0.000000e+00> : vector<4x16xf32>
    %12 = tpu.matmul %11, %0, %cst_16 {dimension_numbers = #tpu.dot_dimension_numbers<[1], [0], [0], [1], [0, 0, 1, 1], [], []>} : vector<4x16xf32>, vector<16x16xf32>, vector<4x16xf32> -> vector<4x16xf32>
    %13 = arith.addf %3, %6 : vector<4x16xf32>
    %14 = arith.subf %3, %6 : vector<4x16xf32>
    %15 = arith.addf %9, %12 : vector<4x16xf32>
    %16 = arith.subf %9, %12 : vector<4x16xf32>
    %17 = arith.addf %13, %15 : vector<4x16xf32>
    %18 = arith.addf %14, %16 : vector<4x16xf32>
    %19 = arith.subf %13, %15 : vector<4x16xf32>
    %20 = arith.subf %14, %16 : vector<4x16xf32>
    %21 = vector.extract_strided_slice %17 {offsets = [0, 0], sizes = [4, 4], strides = [1, 1]} : vector<4x16xf32> to vector<4x4xf32>
    %c0_17 = arith.constant 0 : index
    %c0_18 = arith.constant 0 : index
    %c0_19 = arith.constant 0 : index
    %c0_20 = arith.constant 0 : index
    %c0_21 = arith.constant 0 : index
    %22 = vector.load %arg5[%c0_17, %c0_18, %c0_19, %c0_20, %c0_21] : memref<1x16x1x4x4xf32, #tpu.memory_space<vmem>>, vector<1x1x1x4x4xf32>
    %23 = vector.shape_cast %22 : vector<1x1x1x4x4xf32> to vector<4x4xf32>
    %24 = vector.shape_cast %21 : vector<4x4xf32> to vector<1x1x1x4x4xf32>
    tpu.vector_store %arg5[%c0_17, %c0_18, %c0_19, %c0_20, %c0_21], %24 {strides = array<i32>} : memref<1x16x1x4x4xf32, #tpu.memory_space<vmem>>, vector<1x1x1x4x4xf32>,
    %25 = vector.extract_strided_slice %17 {offsets = [0, 4], sizes = [4, 4], strides = [1, 1]} : vector<4x16xf32> to vector<4x4xf32>
    %c0_22 = arith.constant 0 : index
    %c1_23 = arith.constant 1 : index
    %c0_24 = arith.constant 0 : index
    %c0_25 = arith.constant 0 : index
    %c0_26 = arith.constant 0 : index
    %26 = vector.load %arg5[%c0_22, %c1_23, %c0_24, %c0_25, %c0_26] : memref<1x16x1x4x4xf32, #tpu.memory_space<vmem>>, vector<1x1x1x4x4xf32>
    %27 = vector.shape_cast %26 : vector<1x1x1x4x4xf32> to vector<4x4xf32>
    %28 = vector.shape_cast %25 : vector<4x4xf32> to vector<1x1x1x4x4xf32>
    tpu.vector_store %arg5[%c0_22, %c1_23, %c0_24, %c0_25, %c0_26], %28 {strides = array<i32>} : memref<1x16x1x4x4xf32, #tpu.memory_space<vmem>>, vector<1x1x1x4x4xf32>,
    %29 = vector.extract_strided_slice %17 {offsets = [0, 8], sizes = [4, 4], strides = [1, 1]} : vector<4x16xf32> to vector<4x4xf32>
    %c0_27 = arith.constant 0 : index
    %c4 = arith.constant 4 : index
    %c0_28 = arith.constant 0 : index
    %c0_29 = arith.constant 0 : index
    %c0_30 = arith.constant 0 : index
    %30 = vector.load %arg5[%c0_27, %c4, %c0_28, %c0_29, %c0_30] : memref<1x16x1x4x4xf32, #tpu.memory_space<vmem>>, vector<1x1x1x4x4xf32>
    %31 = vector.shape_cast %30 : vector<1x1x1x4x4xf32> to vector<4x4xf32>
    %32 = vector.shape_cast %29 : vector<4x4xf32> to vector<1x1x1x4x4xf32>
    tpu.vector_store %arg5[%c0_27, %c4, %c0_28, %c0_29, %c0_30], %32 {strides = array<i32>} : memref<1x16x1x4x4xf32, #tpu.memory_space<vmem>>, vector<1x1x1x4x4xf32>,
    %33 = vector.extract_strided_slice %17 {offsets = [0, 12], sizes = [4, 4], strides = [1, 1]} : vector<4x16xf32> to vector<4x4xf32>
    %c0_31 = arith.constant 0 : index
    %c5 = arith.constant 5 : index
    %c0_32 = arith.constant 0 : index
    %c0_33 = arith.constant 0 : index
    %c0_34 = arith.constant 0 : index
    %34 = vector.load %arg5[%c0_31, %c5, %c0_32, %c0_33, %c0_34] : memref<1x16x1x4x4xf32, #tpu.memory_space<vmem>>, vector<1x1x1x4x4xf32>
    %35 = vector.shape_cast %34 : vector<1x1x1x4x4xf32> to vector<4x4xf32>
    %36 = vector.shape_cast %33 : vector<4x4xf32> to vector<1x1x1x4x4xf32>
    tpu.vector_store %arg5[%c0_31, %c5, %c0_32, %c0_33, %c0_34], %36 {strides = array<i32>} : memref<1x16x1x4x4xf32, #tpu.memory_space<vmem>>, vector<1x1x1x4x4xf32>,
    %37 = vector.extract_strided_slice %18 {offsets = [0, 0], sizes = [4, 4], strides = [1, 1]} : vector<4x16xf32> to vector<4x4xf32>
    %c0_35 = arith.constant 0 : index
    %c2_36 = arith.constant 2 : index
    %c0_37 = arith.constant 0 : index
    %c0_38 = arith.constant 0 : index
    %c0_39 = arith.constant 0 : index
    %38 = vector.load %arg5[%c0_35, %c2_36, %c0_37, %c0_38, %c0_39] : memref<1x16x1x4x4xf32, #tpu.memory_space<vmem>>, vector<1x1x1x4x4xf32>
    %39 = vector.shape_cast %38 : vector<1x1x1x4x4xf32> to vector<4x4xf32>
    %40 = vector.shape_cast %37 : vector<4x4xf32> to vector<1x1x1x4x4xf32>
    tpu.vector_store %arg5[%c0_35, %c2_36, %c0_37, %c0_38, %c0_39], %40 {strides = array<i32>} : memref<1x16x1x4x4xf32, #tpu.memory_space<vmem>>, vector<1x1x1x4x4xf32>,
    %41 = vector.extract_strided_slice %18 {offsets = [0, 4], sizes = [4, 4], strides = [1, 1]} : vector<4x16xf32> to vector<4x4xf32>
    %c0_40 = arith.constant 0 : index
    %c3_41 = arith.constant 3 : index
    %c0_42 = arith.constant 0 : index
    %c0_43 = arith.constant 0 : index
    %c0_44 = arith.constant 0 : index
    %42 = vector.load %arg5[%c0_40, %c3_41, %c0_42, %c0_43, %c0_44] : memref<1x16x1x4x4xf32, #tpu.memory_space<vmem>>, vector<1x1x1x4x4xf32>
    %43 = vector.shape_cast %42 : vector<1x1x1x4x4xf32> to vector<4x4xf32>
    %44 = vector.shape_cast %41 : vector<4x4xf32> to vector<1x1x1x4x4xf32>
    tpu.vector_store %arg5[%c0_40, %c3_41, %c0_42, %c0_43, %c0_44], %44 {strides = array<i32>} : memref<1x16x1x4x4xf32, #tpu.memory_space<vmem>>, vector<1x1x1x4x4xf32>,
    %45 = vector.extract_strided_slice %18 {offsets = [0, 8], sizes = [4, 4], strides = [1, 1]} : vector<4x16xf32> to vector<4x4xf32>
    %c0_45 = arith.constant 0 : index
    %c6 = arith.constant 6 : index
    %c0_46 = arith.constant 0 : index
    %c0_47 = arith.constant 0 : index
    %c0_48 = arith.constant 0 : index
    %46 = vector.load %arg5[%c0_45, %c6, %c0_46, %c0_47, %c0_48] : memref<1x16x1x4x4xf32, #tpu.memory_space<vmem>>, vector<1x1x1x4x4xf32>
    %47 = vector.shape_cast %46 : vector<1x1x1x4x4xf32> to vector<4x4xf32>
    %48 = vector.shape_cast %45 : vector<4x4xf32> to vector<1x1x1x4x4xf32>
    tpu.vector_store %arg5[%c0_45, %c6, %c0_46, %c0_47, %c0_48], %48 {strides = array<i32>} : memref<1x16x1x4x4xf32, #tpu.memory_space<vmem>>, vector<1x1x1x4x4xf32>,
    %49 = vector.extract_strided_slice %18 {offsets = [0, 12], sizes = [4, 4], strides = [1, 1]} : vector<4x16xf32> to vector<4x4xf32>
    %c0_49 = arith.constant 0 : index
    %c7 = arith.constant 7 : index
    %c0_50 = arith.constant 0 : index
    %c0_51 = arith.constant 0 : index
    %c0_52 = arith.constant 0 : index
    %50 = vector.load %arg5[%c0_49, %c7, %c0_50, %c0_51, %c0_52] : memref<1x16x1x4x4xf32, #tpu.memory_space<vmem>>, vector<1x1x1x4x4xf32>
    %51 = vector.shape_cast %50 : vector<1x1x1x4x4xf32> to vector<4x4xf32>
    %52 = vector.shape_cast %49 : vector<4x4xf32> to vector<1x1x1x4x4xf32>
    tpu.vector_store %arg5[%c0_49, %c7, %c0_50, %c0_51, %c0_52], %52 {strides = array<i32>} : memref<1x16x1x4x4xf32, #tpu.memory_space<vmem>>, vector<1x1x1x4x4xf32>,
    %53 = vector.extract_strided_slice %19 {offsets = [0, 0], sizes = [4, 4], strides = [1, 1]} : vector<4x16xf32> to vector<4x4xf32>
    %c0_53 = arith.constant 0 : index
    %c8 = arith.constant 8 : index
    %c0_54 = arith.constant 0 : index
    %c0_55 = arith.constant 0 : index
    %c0_56 = arith.constant 0 : index
    %54 = vector.load %arg5[%c0_53, %c8, %c0_54, %c0_55, %c0_56] : memref<1x16x1x4x4xf32, #tpu.memory_space<vmem>>, vector<1x1x1x4x4xf32>
    %55 = vector.shape_cast %54 : vector<1x1x1x4x4xf32> to vector<4x4xf32>
    %56 = vector.shape_cast %53 : vector<4x4xf32> to vector<1x1x1x4x4xf32>
    tpu.vector_store %arg5[%c0_53, %c8, %c0_54, %c0_55, %c0_56], %56 {strides = array<i32>} : memref<1x16x1x4x4xf32, #tpu.memory_space<vmem>>, vector<1x1x1x4x4xf32>,
    %57 = vector.extract_strided_slice %19 {offsets = [0, 4], sizes = [4, 4], strides = [1, 1]} : vector<4x16xf32> to vector<4x4xf32>
    %c0_57 = arith.constant 0 : index
    %c9 = arith.constant 9 : index
    %c0_58 = arith.constant 0 : index
    %c0_59 = arith.constant 0 : index
    %c0_60 = arith.constant 0 : index
    %58 = vector.load %arg5[%c0_57, %c9, %c0_58, %c0_59, %c0_60] : memref<1x16x1x4x4xf32, #tpu.memory_space<vmem>>, vector<1x1x1x4x4xf32>
    %59 = vector.shape_cast %58 : vector<1x1x1x4x4xf32> to vector<4x4xf32>
    %60 = vector.shape_cast %57 : vector<4x4xf32> to vector<1x1x1x4x4xf32>
    tpu.vector_store %arg5[%c0_57, %c9, %c0_58, %c0_59, %c0_60], %60 {strides = array<i32>} : memref<1x16x1x4x4xf32, #tpu.memory_space<vmem>>, vector<1x1x1x4x4xf32>,
    %61 = vector.extract_strided_slice %19 {offsets = [0, 8], sizes = [4, 4], strides = [1, 1]} : vector<4x16xf32> to vector<4x4xf32>
    %c0_61 = arith.constant 0 : index
    %c12 = arith.constant 12 : index
    %c0_62 = arith.constant 0 : index
    %c0_63 = arith.constant 0 : index
    %c0_64 = arith.constant 0 : index
    %62 = vector.load %arg5[%c0_61, %c12, %c0_62, %c0_63, %c0_64] : memref<1x16x1x4x4xf32, #tpu.memory_space<vmem>>, vector<1x1x1x4x4xf32>
    %63 = vector.shape_cast %62 : vector<1x1x1x4x4xf32> to vector<4x4xf32>
    %64 = vector.shape_cast %61 : vector<4x4xf32> to vector<1x1x1x4x4xf32>
    tpu.vector_store %arg5[%c0_61, %c12, %c0_62, %c0_63, %c0_64], %64 {strides = array<i32>} : memref<1x16x1x4x4xf32, #tpu.memory_space<vmem>>, vector<1x1x1x4x4xf32>,
    %65 = vector.extract_strided_slice %19 {offsets = [0, 12], sizes = [4, 4], strides = [1, 1]} : vector<4x16xf32> to vector<4x4xf32>
    %c0_65 = arith.constant 0 : index
    %c13 = arith.constant 13 : index
    %c0_66 = arith.constant 0 : index
    %c0_67 = arith.constant 0 : index
    %c0_68 = arith.constant 0 : index
    %66 = vector.load %arg5[%c0_65, %c13, %c0_66, %c0_67, %c0_68] : memref<1x16x1x4x4xf32, #tpu.memory_space<vmem>>, vector<1x1x1x4x4xf32>
    %67 = vector.shape_cast %66 : vector<1x1x1x4x4xf32> to vector<4x4xf32>
    %68 = vector.shape_cast %65 : vector<4x4xf32> to vector<1x1x1x4x4xf32>
    tpu.vector_store %arg5[%c0_65, %c13, %c0_66, %c0_67, %c0_68], %68 {strides = array<i32>} : memref<1x16x1x4x4xf32, #tpu.memory_space<vmem>>, vector<1x1x1x4x4xf32>,
    %69 = vector.extract_strided_slice %20 {offsets = [0, 0], sizes = [4, 4], strides = [1, 1]} : vector<4x16xf32> to vector<4x4xf32>
    %c0_69 = arith.constant 0 : index
    %c10 = arith.constant 10 : index
    %c0_70 = arith.constant 0 : index
    %c0_71 = arith.constant 0 : index
    %c0_72 = arith.constant 0 : index
    %70 = vector.load %arg5[%c0_69, %c10, %c0_70, %c0_71, %c0_72] : memref<1x16x1x4x4xf32, #tpu.memory_space<vmem>>, vector<1x1x1x4x4xf32>
    %71 = vector.shape_cast %70 : vector<1x1x1x4x4xf32> to vector<4x4xf32>
    %72 = vector.shape_cast %69 : vector<4x4xf32> to vector<1x1x1x4x4xf32>
    tpu.vector_store %arg5[%c0_69, %c10, %c0_70, %c0_71, %c0_72], %72 {strides = array<i32>} : memref<1x16x1x4x4xf32, #tpu.memory_space<vmem>>, vector<1x1x1x4x4xf32>,
    %73 = vector.extract_strided_slice %20 {offsets = [0, 4], sizes = [4, 4], strides = [1, 1]} : vector<4x16xf32> to vector<4x4xf32>
    %c0_73 = arith.constant 0 : index
    %c11 = arith.constant 11 : index
    %c0_74 = arith.constant 0 : index
    %c0_75 = arith.constant 0 : index
    %c0_76 = arith.constant 0 : index
    %74 = vector.load %arg5[%c0_73, %c11, %c0_74, %c0_75, %c0_76] : memref<1x16x1x4x4xf32, #tpu.memory_space<vmem>>, vector<1x1x1x4x4xf32>
    %75 = vector.shape_cast %74 : vector<1x1x1x4x4xf32> to vector<4x4xf32>
    %76 = vector.shape_cast %73 : vector<4x4xf32> to vector<1x1x1x4x4xf32>
    tpu.vector_store %arg5[%c0_73, %c11, %c0_74, %c0_75, %c0_76], %76 {strides = array<i32>} : memref<1x16x1x4x4xf32, #tpu.memory_space<vmem>>, vector<1x1x1x4x4xf32>,
    %77 = vector.extract_strided_slice %20 {offsets = [0, 8], sizes = [4, 4], strides = [1, 1]} : vector<4x16xf32> to vector<4x4xf32>
    %c0_77 = arith.constant 0 : index
    %c14 = arith.constant 14 : index
    %c0_78 = arith.constant 0 : index
    %c0_79 = arith.constant 0 : index
    %c0_80 = arith.constant 0 : index
    %78 = vector.load %arg5[%c0_77, %c14, %c0_78, %c0_79, %c0_80] : memref<1x16x1x4x4xf32, #tpu.memory_space<vmem>>, vector<1x1x1x4x4xf32>
    %79 = vector.shape_cast %78 : vector<1x1x1x4x4xf32> to vector<4x4xf32>
    %80 = vector.shape_cast %77 : vector<4x4xf32> to vector<1x1x1x4x4xf32>
    tpu.vector_store %arg5[%c0_77, %c14, %c0_78, %c0_79, %c0_80], %80 {strides = array<i32>} : memref<1x16x1x4x4xf32, #tpu.memory_space<vmem>>, vector<1x1x1x4x4xf32>,
    %81 = vector.extract_strided_slice %20 {offsets = [0, 12], sizes = [4, 4], strides = [1, 1]} : vector<4x16xf32> to vector<4x4xf32>
    %c0_81 = arith.constant 0 : index
    %c15 = arith.constant 15 : index
    %c0_82 = arith.constant 0 : index
    %c0_83 = arith.constant 0 : index
    %c0_84 = arith.constant 0 : index
    %82 = vector.load %arg5[%c0_81, %c15, %c0_82, %c0_83, %c0_84] : memref<1x16x1x4x4xf32, #tpu.memory_space<vmem>>, vector<1x1x1x4x4xf32>
    %83 = vector.shape_cast %82 : vector<1x1x1x4x4xf32> to vector<4x4xf32>
    %84 = vector.shape_cast %81 : vector<4x4xf32> to vector<1x1x1x4x4xf32>
    tpu.vector_store %arg5[%c0_81, %c15, %c0_82, %c0_83, %c0_84], %84 {strides = array<i32>} : memref<1x16x1x4x4xf32, #tpu.memory_space<vmem>>, vector<1x1x1x4x4xf32>,
    return
  }
  func.func @transform_0(%arg0: i32, %arg1: i32, %arg2: i32) -> (i32, i32, i32, i32) {
    %c0_i32 = arith.constant 0 : i32
    %c0_i32_0 = arith.constant 0 : i32
    return %arg0, %arg1, %arg2, %c0_i32 : i32, i32, i32, i32
  }
  func.func @transform_1(%arg0: i32, %arg1: i32, %arg2: i32) -> (i32, i32) {
    %c0_i32 = arith.constant 0 : i32
    %c0_i32_0 = arith.constant 0 : i32
    %c0_i32_1 = arith.constant 0 : i32
    return %c0_i32, %c0_i32_0 : i32, i32
  }
  func.func @transform_2(%arg0: i32, %arg1: i32, %arg2: i32) -> (i32, i32, i32, i32, i32) {
    %c0_i32 = arith.constant 0 : i32
    %c0_i32_0 = arith.constant 0 : i32
    %c0_i32_1 = arith.constant 0 : i32
    return %arg0, %c0_i32, %arg1, %arg2, %c0_i32_0 : i32, i32, i32, i32, i32
  }
}

</mosaic_0001>

<bundles_post_ra>
// kernel: harrnet_forward.1
= control target key start
LH: loop header
LB: loop body
LE: loop exit
PB: predicated region body
PF: predicated region fallthrough
CT: control target
= control target key end

     0   :  { %s1077_s0 = inlined_call_operand.hbm [shape: f32[2,3,16,16], index: 0, kind: input, shape index: {}]   ;;  %s1078_s1 = inlined_call_operand.hbm [shape: f32[16,16], index: 1, kind: input, shape index: {}]   ;;  %s1079_s2 = inlined_call_operand.vmem [shape: f32[2,16,3,4,4], index: 2, kind: output, shape index: {}]  }
   0x1   :  { %1085 = sst [smem:[#allocation12_spill]] %s1078_s1 }
   0x2   :  { %7 = vsyncpa [#allocation3], 0 }
   0x3   :  { %9 = vsyncpa [#allocation3 + $0x1], 0 }
   0x4   :  { %10 = vsyncpa [#allocation5], 0  ;;  %s878_s9 = smov 0   ;;  %s880_s10 = smov 0  }
   0x5   :  { %s882_s11 = smov 0   ;;  %s884_s12 = smov 0  }
   0x6   :  { %s886_s13 = smov 0   ;;  %s888_s14 = smov 0  }
   0x7   :  { %s890_s15 = smov 0   ;;  %s892_s16 = smov 0  }
   0x8 LB: > { %1086 = sst [smem:[#allocation9_spill]] %s855_s16  ;;  %s598_s17 = sadd.s32 4294967295, %s855_s16   ;;  %s855_s16 = sphi %s892_s16, %s16_s16   ;;  %s851_s15 = sphi %s890_s15, %s1105_s15   ;;  %s847_s14 = sphi %s888_s14, %s1104_s14   ;;  %s843_s13 = sphi %s886_s13, %s1103_s13   ;;  %s839_s12 = sphi %s884_s12, %s1102_s12   ;;  %s835_s11 = sphi %s882_s11, %s1101_s11   ;;  %s831_s10 = sphi %s880_s10, %s1100_s10   ;;  %s827_s9 = sphi %s878_s9, %s1099_s9  }
   0x9   : > { %p59_p0 = scmp.ne.s32.totalorder %s831_s10, %s827_s9  ;;  %p918_p1 = scmp.eq.s32.totalorder %s598_s17, 0 }
   0xa   : > { %p600_p2 = scmp.ge.s32.totalorder %s855_s16, 1  ;;  %p121_p3 = scmp.lt.s32.totalorder %s855_s16, 7 }
   0xb   : > { %p926_p4 = por %p918_p1, %p59_p0  ;;  %s1090_s1 = sld [smem:[#allocation12_spill]] }
   0xc   : > { %p930_p5 = pnand %p600_p2, %p121_p3  ;;  %s857_s24 = smov [#allocation4]  }
   0xd   : > { %s134_s25 = sshll.u32 %s857_s24, 4  ;;  %s1080_s26 = smov 128   ;;  %s135_s25 = int_to_ptr.vmem [resolvable:$true] %s134_s25 }
   0xe   : > { %p644_p6 = pneg %p930_p5  ;;  %s1081_s27 = smov 8  }
   0xf   : > { %p108_p8 = scmp.eq.s32.totalorder %s598_s17, 5  ;;  %s31_s28 = sadd.s32 1, %s847_s14 }
  0x10   : > { %p645_p7 = pnand %p644_p6, %p918_p1  ;;  %p33_p9 = scmp.ge.s32.totalorder %s31_s28, 3 }
  0x11   : > { %s132_s23 = sshll.u32 %s1090_s1, 4  ;;  %s35_s29 = sadd.s32 1, %s851_s15  ;;  %s133_s23 = int_to_ptr.hbm [resolvable:$true] %s132_s23 }
  0x12   : > { %647 = dma.hbm_to_vmem [thread:$0]  (!%p645_p7), %s133_s23, 256, %s135_s25, [#allocation5], %s1080_s26, %s1080_s26, %s1081_s27  }
  0x13   : > { %p53_p10 = scmp.ne.s32.totalorder %s835_s11, %s831_s10  ;;  %p54_p11 = scmp.eq.s32.totalorder %s855_s16, 0 }
  0x14   : > { %s1107_s28 = smov (%p33_p9, %s31_s28), 0  ;;  %s1109_s29 = smov (!%p33_p9, %s35_s29), %s851_s15 }
  0x15   : > { %1091 = sst [smem:[#allocation10_spill]] %s1107_s28  ;;  %s40_s30 = ssub.s32 %s847_s14, %s1107_s28 }
  0x16   : > { %s46_s3 = sadd.s32 1, %s835_s11  ;;  %p37_p12 = scmp.ge.s32.totalorder %s1109_s29, 2 }
  0x17   : > { %p955_p13 = por %p108_p8, %p53_p10  ;;  %p55_p0 = por %p54_p11, %p53_p10 }
  0x18   : > { %s148_s5 = sand.u32 1, %s835_s11   ;;  %s1111_s29 = smov (%p37_p12, %s1109_s29), 0 }
  0x19   : > { %1093 = sst [smem:[#allocation11_spill]] %s1111_s29  ;;  %p653_p2 = scmp.lt.s32.totalorder %s855_s16, 6 }
  0x1a   : > { %s603_s6 = sshll.u32 %s148_s5, 4  ;;  %s39_s7 = ssub.s32 %s851_s15, %s1111_s29 }
  0x1b   : > { %s41_s8 = sor.u32 %s40_s30, %s39_s7  ;;  %s604_s9 = sshll.u32 %s847_s14, 1 }
  0x1c   : > { %p44_p3 = scmp.eq.s32.totalorder %s41_s8, 0  ;;  %s636_s17 = smul.u32 6, %s851_s15 }
  0x1d   : > { %s152_s21 = scalar_lea.vmem [#allocation2], %s603_s6  ;;  %p649_p6 = pnand %p653_p2, %p55_p0 }
  0x1e   : > { %s164_s22 = sshll.u32 %s152_s21, 4  ;;  %s159_s24 = sadd.s32 %s636_s17, %s604_s9  ;;  %s165_s22 = int_to_ptr.vmem [resolvable:$true] %s164_s22 }
  0x1f   : > { %s968_s23 = scalar_select %p44_p3, %s835_s11, %s46_s3  }
  0x20   : > { %s605_s25 = sshll.u32 %s159_s24, 3  ;;  %s149_s16 = scalar_lea.sflag [#allocation3], %s148_s5 }
  0x21   : > { %s161_s1 = scalar_lea.hbm %s1077_s0, %s605_s25  ;;  %s1094_s29 = smov 8  }
  0x22   : > { %s162_s28 = sshll.u32 %s161_s1, 4  ;;  %s1095_s30 = smov 128   ;;  %s163_s28 = int_to_ptr.hbm [resolvable:$true] %s162_s28 }
  0x23   : > { %651 = dma.hbm_to_vmem [thread:$0]  (!%p649_p6), %s163_s28, 256, %s165_s22, %s149_s16, %s1095_s30, %s1095_s30, %s1094_s29  }
  0x24   : > { %176 = sbr.rel (%p930_p5) target bundleno = 333 (0x14d), region = 28  ;;  %s979_s3 = sand.u32 (!%p930_p5), 1, %s831_s10  }
  0x25   : > { %s607_s6 = sshll.u32 (!%p930_p5), %s979_s3, 4  ;;  %s179_s26 = scalar_lea.sflag (!%p930_p5), [#allocation3], %s979_s3 }
  0x26   : > { %s182_s27 = scalar_lea.vmem (!%p930_p5), [#allocation2], %s607_s6 }
  0x29   : > { %818 = dma.done.wait (%p926_p4), %s179_s26, 256  }
  0x2a   : > { %820 = vsyncadd (%p926_p4), %s179_s26, 4294967040 }
  0x2b   : > { %822 = dma.done.wait (%p918_p1), [#allocation5], 256  }
  0x2c   : > { %824 = vsyncadd (%p918_p1), [#allocation5], 4294967040  ;;  %v210_v0 = vld [vmem:[#allocation4 + $0x8] sm:$0xff]  ;;  %v209_v1 = vld [vmem:[#allocation4] sm:$0xff]  ;;  %vm212_vm0 = vcmask 130048   ;;  %s609_s1 = sshll.u32 %s979_s3, 6 }
  0x2d   : > { %280 = vmatpush.msra.mxu2 %v210_v0  ;;  %305 = vmatpush.msra.mxu3 %v210_v0  ;;  %v613_v2 = vld [vmem:[%s182_s27 + $0x2] ss:$4 sm:$0xf]  ;;  %v615_v3 = vld [vmem:[%s182_s27 + $0x3] ss:$4 sm:$0xf] }
  0x2e   : > { %230 = vmatpush.msra.mxu0 %v210_v0  ;;  %255 = vmatpush.msra.mxu1 %v210_v0  ;;  %v211_v4 = vld [vmem:[%s182_s27] ss:$4 sm:$0xf]  ;;  %v611_v5 = vld [vmem:[%s182_s27 + $0x1] ss:$4 sm:$0xf] }
  0x2f   : > { %281 = vmatpush.msra.mxu2 %v209_v1  ;;  %306 = vmatpush.msra.mxu3 %v209_v1  ;;  %vm319_vm1 = vcmask 27648   ;;  %s996_s16 = scalar_lea.vmem [#allocation6], %s609_s1  ;;  %s860_s18 = smov 120  }
  0x30   : > { %614 = vmatmul.msk.f32.vlgmr.msra.gmra.mxu2 %vm212_vm0, %v613_v2  ;;  %616 = vmatmul.msk.f32.vlgmr.msra.gmra.mxu3 %vm212_vm0, %v615_v3  ;;  %s861_s19 = smov 116   ;;  %s862_s20 = smov 124  }
  0x31   : > { %231 = vmatpush.msra.mxu0 %v209_v1  ;;  %256 = vmatpush.msra.mxu1 %v209_v1  ;;  %s637_s28 = smul.u32 (%p955_p13), 48, %s843_s13 }
  0x32   : > { %610 = vmatmul.msk.f32.vlgmr.msra.gmra.mxu0 %vm212_vm0, %v211_v4  ;;  %612 = vmatmul.msk.f32.vlgmr.msra.gmra.mxu1 %vm212_vm0, %v611_v5 }
  0x33   : > { %s400_s29 = sadd.s32 (%p955_p13), %s839_s12, %s637_s28 }
  0x34   : > { %s633_s5 = sshll.u32 (%p955_p13), %s400_s29, 2 }
  0x35   : > { %s402_s4 = scalar_lea.vmem (%p955_p13), %s1079_s2, %s633_s5 }
  0xaf   : > { %v233_v6 = vpop.f32.mrf.mxu0  ;;  %v258_v7 = vpop.f32.mrf.mxu1 }
  0xb0   : > { %v311_v8 = vadd.f32 %v258_v7, %v233_v6  ;;  %v312_v9 = vsub.f32 %v233_v6, %v258_v7 }
  0xb3   : > { %v283_v10 = vpop.f32.mrf.mxu2  ;;  %v308_v11 = vpop.f32.mrf.mxu3 }
  0xb4   : > { %v313_v12 = vadd.f32 %v308_v11, %v283_v10  ;;  %v314_v13 = vsub.f32 %v283_v10, %v308_v11 }
  0xb6   : > { %v315_v14 = vadd.f32 %v313_v12, %v311_v8  ;;  %v316_v15 = vadd.f32 %v314_v13, %v312_v9  ;;  %v317_v16 = vsub.f32 %v311_v8, %v313_v12  ;;  %v318_v17 = vsub.f32 %v312_v9, %v314_v13 }
  0xb8   : > { %320 = vst.msk [vmem:[%s996_s16] sm:$0xf] %vm319_vm1, %v315_v14  ;;  %345 = vrot.lane.b32.xlu2 %v316_v15, %s860_s18  ;;  %332 = vrot.lane.b32.xlu1 %v315_v14, %s861_s19 }
  0xb9   : > { %620 = vst.msk [vmem:[%s996_s16 + $0x8] sm:$0xf] %vm319_vm1, %v316_v15  ;;  %322 = vrot.lane.b32.xlu0 %v315_v14, %s862_s20 }
  0xba   : > { %624 = vst.msk [vmem:[%s996_s16 + $0x20] sm:$0xf] %vm319_vm1, %v317_v16 }
  0xbb   : > { %628 = vst.msk [vmem:[%s996_s16 + $0x28] sm:$0xf] %vm319_vm1, %v318_v17 }
  0xbf   : > { %v419_v30 = vld [vmem:[%s996_s16] sm:$0xf] (%p955_p13) }
  0xc0   : > { %350 = vrot.lane.b32.xlu2 %v316_v15, %s861_s19  ;;  %340 = vrot.lane.b32.xlu1 %v316_v15, %s862_s20  ;;  %v423_v32 = vld [vmem:[%s996_s16 + $0x8] sm:$0xf] (%p955_p13)  ;;  %420 = vst [vmem:[%s402_s4] sm:$0xf] (%p955_p13), %v419_v30 }
  0xc1   : > { %327 = vrot.lane.b32.xlu0 %v315_v14, %s860_s18  ;;  %424 = vst [vmem:[%s402_s4 + $0x18] sm:$0xf] (%p955_p13), %v423_v32  ;;  %v435_v38 = vld [vmem:[%s996_s16 + $0x20] sm:$0xf] (%p955_p13) }
  0xc2   : > { %v439_v40 = vld [vmem:[%s996_s16 + $0x28] sm:$0xf] (%p955_p13)  ;;  %436 = vst [vmem:[%s402_s4 + $0x60] sm:$0xf] (%p955_p13), %v435_v38 }
  0xc3   : > { %440 = vst [vmem:[%s402_s4 + $0x78] sm:$0xf] (%p955_p13), %v439_v40 }
  0xc8   : > { %368 = vrot.lane.b32.xlu2 %v317_v16, %s861_s19  ;;  %363 = vrot.lane.b32.xlu1 %v317_v16, %s860_s18 }
  0xc9   : > { %358 = vrot.lane.b32.xlu0 %v317_v16, %s862_s20 }
  0xd0   : > { %386 = vrot.lane.b32.xlu2 %v318_v17, %s861_s19  ;;  %381 = vrot.lane.b32.xlu1 %v318_v17, %s860_s18 }
  0xd1   : > { %376 = vrot.lane.b32.xlu0 %v318_v17, %s862_s20 }
 0x112   : > { %v346_v18 = vpop.permute.xlu2 %345 }
 0x113   : > { %622 = vst.msk [vmem:[%s996_s16 + $0x18] sm:$0xf] %vm319_vm1, %v346_v18 }
 0x11a   : > { %v351_v19 = vpop.permute.xlu2 %350  ;;  %v431_v36 = vld [vmem:[%s996_s16 + $0x18] sm:$0xf] (%p955_p13) }
 0x11b   : > { %623 = vst.msk [vmem:[%s996_s16 + $0x1c] sm:$0xf] %vm319_vm1, %v351_v19 }
 0x11c   : > { %432 = vst [vmem:[%s402_s4 + $0x48] sm:$0xf] (%p955_p13), %v431_v36 }
 0x122   : > { %v369_v20 = vpop.permute.xlu2 %368  ;;  %v433_v37 = vld [vmem:[%s996_s16 + $0x1c] sm:$0xf] (%p955_p13) }
 0x123   : > { %627 = vst.msk [vmem:[%s996_s16 + $0x34] sm:$0xf] %vm319_vm1, %v369_v20 }
 0x124   : > { %434 = vst [vmem:[%s402_s4 + $0x54] sm:$0xf] (%p955_p13), %v433_v37 }
 0x12a   : > { %v387_v21 = vpop.permute.xlu2 %386  ;;  %v333_v22 = vpop.permute.xlu1 %332  ;;  %v445_v43 = vld [vmem:[%s996_s16 + $0x34] sm:$0xf] (%p955_p13) }
 0x12b   : > { %631 = vst.msk [vmem:[%s996_s16 + $0x3c] sm:$0xf] %vm319_vm1, %v387_v21  ;;  %v323_v23 = vpop.permute.xlu0 %322 }
 0x12c   : > { %619 = vst.msk [vmem:[%s996_s16 + $0x14] sm:$0xf] %vm319_vm1, %v333_v22 }
 0x12d   : > { %617 = vst.msk [vmem:[%s996_s16 + $0x4] sm:$0xf] %vm319_vm1, %v323_v23 }
 0x12e   : > { %446 = vst [vmem:[%s402_s4 + $0x9c] sm:$0xf] (%p955_p13), %v445_v43 }
 0x132   : > { %v341_v24 = vpop.permute.xlu1 %340  ;;  %v449_v45 = vld [vmem:[%s996_s16 + $0x3c] sm:$0xf] (%p955_p13) }
 0x133   : > { %621 = vst.msk [vmem:[%s996_s16 + $0xc] sm:$0xf] %vm319_vm1, %v341_v24  ;;  %v328_v25 = vpop.permute.xlu0 %327  ;;  %v429_v35 = vld [vmem:[%s996_s16 + $0x14] sm:$0xf] (%p955_p13) }
 0x134   : > { %618 = vst.msk [vmem:[%s996_s16 + $0x10] sm:$0xf] %vm319_vm1, %v328_v25  ;;  %v421_v31 = vld [vmem:[%s996_s16 + $0x4] sm:$0xf] (%p955_p13) }
 0x135   : > { %422 = vst [vmem:[%s402_s4 + $0xc] sm:$0xf] (%p955_p13), %v421_v31 }
 0x136   : > { %430 = vst [vmem:[%s402_s4 + $0x3c] sm:$0xf] (%p955_p13), %v429_v35 }
 0x137   : > { %450 = vst [vmem:[%s402_s4 + $0xb4] sm:$0xf] (%p955_p13), %v449_v45 }
 0x13a   : > { %v364_v26 = vpop.permute.xlu1 %363  ;;  %v425_v33 = vld [vmem:[%s996_s16 + $0xc] sm:$0xf] (%p955_p13) }
 0x13b   : > { %626 = vst.msk [vmem:[%s996_s16 + $0x30] sm:$0xf] %vm319_vm1, %v364_v26  ;;  %v359_v27 = vpop.permute.xlu0 %358  ;;  %v427_v34 = vld [vmem:[%s996_s16 + $0x10] sm:$0xf] (%p955_p13) }
 0x13c   : > { %625 = vst.msk [vmem:[%s996_s16 + $0x24] sm:$0xf] %vm319_vm1, %v359_v27 }
 0x13d   : > { %426 = vst [vmem:[%s402_s4 + $0x24] sm:$0xf] (%p955_p13), %v425_v33 }
 0x13e   : > { %428 = vst [vmem:[%s402_s4 + $0x30] sm:$0xf] (%p955_p13), %v427_v34 }
 0x140   : > { %397 = sbr.rel (!%p955_p13) target bundleno = 333 (0x14d), region = 40 }
 0x142   : > { %v382_v28 = vpop.permute.xlu1 %381  ;;  %v443_v42 = vld [vmem:[%s996_s16 + $0x30] sm:$0xf] (%p955_p13) }
 0x143   : > { %630 = vst.msk [vmem:[%s996_s16 + $0x38] sm:$0xf] %vm319_vm1, %v382_v28  ;;  %v377_v29 = vpop.permute.xlu0 %376  ;;  %v437_v39 = vld [vmem:[%s996_s16 + $0x24] sm:$0xf] (%p955_p13) }
 0x144   : > { %629 = vst.msk [vmem:[%s996_s16 + $0x2c] sm:$0xf] %vm319_vm1, %v377_v29 }
 0x145   : > { %438 = vst [vmem:[%s402_s4 + $0x6c] sm:$0xf] %v437_v39 }
 0x146   : > { %444 = vst [vmem:[%s402_s4 + $0x90] sm:$0xf] %v443_v42 }
 0x14a   : > { %v447_v44 = vld [vmem:[%s996_s16 + $0x38] sm:$0xf] }
 0x14b   : > { %v441_v41 = vld [vmem:[%s996_s16 + $0x2c] sm:$0xf]  ;;  %448 = vst [vmem:[%s402_s4 + $0xa8] sm:$0xf] %v447_v44 }
 0x14c   : > { %442 = vst [vmem:[%s402_s4 + $0x84] sm:$0xf] %v441_v41 }
 0x14d PF: > { %s1096_s12 = sld [smem:[#allocation9_spill]]  ;;  %s1099_s9 = smov %s831_s10 }
 0x14e   : > { %s1097_s17 = sld [smem:[#allocation10_spill]]  ;;  %s1100_s10 = smov %s835_s11 }
 0x14f   : > { %s1098_s21 = sld [smem:[#allocation11_spill]]  ;;  %s1101_s11 = smov %s968_s23 }
 0x150   : > { %s1103_s13 = smov %s851_s15 }
 0x153   : > { %s16_s16 = sadd.s32 1, %s1096_s12   ;;  %s1102_s12 = smov %s847_s14 }
 0x154   : > { %p13_p1 = scmp.ge.s32.totalorder %s16_s16, 8   ;;  %s1104_s14 = smov %s1097_s17 }
 0x155   : > { %s1105_s15 = smov %s1098_s21 }
 0x156   :  { %15 = sbr.rel (!%p13_p1) target bundleno = 8 (0x8), region = 131 }
 0x15b   :  { %516 = vsyncpa [#allocation3], 1 }
 0x15c   :  { %518 = vsyncpa [#allocation3 + $0x1], 1 }
 0x15d   :  { %519 = vsyncpa [#allocation5], 1 }

</bundles_post_ra>
